<compile_context>
chip_gen: v7x
topology: tpu7x:2x2x1
jax: 0.10.0
libtpu: 0.0.40
codegen_flags: <defaults>
</compile_context>

<pallas_src>
import functools

import jax
import jax.numpy as jnp
from jax import lax
from jax.experimental import pallas as pl
from jax.experimental.pallas import tpu as pltpu


# ---------------------------------------------------------------------------
# helpers
# ---------------------------------------------------------------------------

_SUBLANE_BY_ITEMSIZE = {4: 8, 2: 16, 1: 32}


def _min_sublane(dtype):
    return _SUBLANE_BY_ITEMSIZE.get(jnp.dtype(dtype).itemsize, 8)


def _round_up(a, b):
    return ((a + b - 1) // b) * b


def _fix_rb(rb, n_ts, sub):
    """Clamp/round a row-block size to a legal (sublane-tiled) value."""
    rb = min(rb, n_ts)
    if rb == n_ts:
        return rb
    rb = _round_up(rb, sub)
    return n_ts if rb >= n_ts else rb


def _vmem_limit_bytes():
    """Scoped-VMEM request, generation aware, with headroom for Mosaic scratch."""
    cap = 64 << 20  # conservative default: v7x physical VMEM per TC
    try:
        info = pltpu.get_tpu_info()
        cap = int(getattr(info, "vmem_capacity_bytes", cap))
    except Exception:
        pass
    # Never ask for more than ~65% of physical VMEM (leaves room for internal
    # scratch + double buffers); cap at 80 MiB on 128 MiB parts.
    limit = int(min(cap * 0.65, 80 << 20))
    return max(limit, 16 << 20)


# ---------------------------------------------------------------------------
# kernels
# ---------------------------------------------------------------------------

def _meanstd_onepass_kernel(x_ref, o_ref):
    """Per-row (dim=1) mean/std normalization of one (rb, T) block, full T."""
    x = x_ref[...].astype(jnp.float32)
    T = x.shape[1]
    mean = jnp.mean(x, axis=1, keepdims=True)
    centered = x - mean
    # torch.std default is the unbiased (N-1) estimator.
    var = jnp.sum(centered * centered, axis=1, keepdims=True) / jnp.float32(T - 1)
    inv_std = lax.rsqrt(var)  # EUP rsqrt; keeps the VALU slot for the mul below
    o_ref[...] = (centered * inv_std).astype(o_ref.dtype)


def _stats_kernel(x_ref, mean_ref, rstd_ref, *, total_t, t_block):
    """Pass 1 of the T-tiled path: accumulate sum(x), sum(x^2) per row.

    The two tiny (rb, 1) output tiles are used directly as accumulators
    (their block index is constant along the T grid axis); at the last T step
    they are overwritten with mean and 1/std.
    """
    t = pl.program_id(1)

    @pl.when(t == 0)
    def _():
        mean_ref[...] = jnp.zeros_like(mean_ref)
        rstd_ref[...] = jnp.zeros_like(rstd_ref)

    x = x_ref[...].astype(jnp.float32)
    if total_t % t_block != 0:
        # Ragged final T block: mask out-of-range lanes before reducing.
        col = t * t_block + lax.broadcasted_iota(jnp.int32, x.shape, 1)
        x = jnp.where(col < total_t, x, 0.0)

    mean_ref[...] += jnp.sum(x, axis=1, keepdims=True)        # running sum(x)
    rstd_ref[...] += jnp.sum(x * x, axis=1, keepdims=True)    # running sum(x^2)

    @pl.when(t == pl.num_programs(1) - 1)
    def _():
        n = jnp.float32(total_t)
        s = mean_ref[...]
        ss = rstd_ref[...]
        mu = s / n
        # unbiased (N-1) variance, matching torch.std default
        var = jnp.maximum((ss - n * mu * mu) / (n - 1.0), 0.0)
        mean_ref[...] = mu
        rstd_ref[...] = lax.rsqrt(var)


def _normalize_kernel(mean_ref, rstd_ref, x_ref, o_ref):
    """Pass 2 of the T-tiled path: out = (x - mean) * rstd."""
    x = x_ref[...].astype(jnp.float32)
    o_ref[...] = ((x - mean_ref[...]) * rstd_ref[...]).astype(o_ref.dtype)


# ---------------------------------------------------------------------------
# wrapper
# ---------------------------------------------------------------------------

def mean_std_normalization(data, *, row_block=None, t_block=None):
    """data: (n_ts, T). Returns (data - mean) / std along dim=1 (unbiased std)."""
    n_ts, T = data.shape
    in_size = jnp.dtype(data.dtype).itemsize
    out_size = in_size
    sub = _min_sublane(data.dtype)

    vmem_limit = _vmem_limit_bytes()
    block_budget = int(vmem_limit * 0.6)

    # Approx. VMEM bytes per (row, time) element of a block for the heaviest
    # kernel: input (x2 double-buffer) + output (x2) + ~3 f32 intermediates
    # (the f32 cast, centered, product).
    per_elem = 2 * in_size + 2 * out_size + 3 * 4

    single_pass = (t_block is None) and (sub * T * per_elem <= block_budget)

    # ------------------------------------------------------------------ #
    # Single-pass path: full T in the lane axis, grid over row blocks.
    # ------------------------------------------------------------------ #
    if single_pass:
        if row_block is not None:
            rb = _fix_rb(row_block, n_ts, sub)
        else:
            max_rows = max((block_budget // (T * per_elem)) // sub * sub, sub)
            if n_ts <= sub:
                rb = n_ts  # full extent (legal even if < sublane tile)
            else:
                # Aim for >= 2 row blocks so both v7x TensorCores get work.
                half = -(-n_ts // 2)
                rb = _fix_rb(min(max_rows, _round_up(half, sub)), n_ts, sub)

        grid = (pl.cdiv(n_ts, rb),)
        vmem_needed = rb * T * per_elem + (2 << 20)
        vmem_bytes = int(min(max(vmem_needed, 8 << 20), vmem_limit))
        cost = pl.CostEstimate(
            flops=5 * n_ts * T,
            transcendentals=n_ts,
            bytes_accessed=n_ts * T * (in_size + out_size),
        )
        return pl.pallas_call(
            _meanstd_onepass_kernel,
            out_shape=jax.ShapeDtypeStruct((n_ts, T), data.dtype),
            grid=grid,
            in_specs=[pl.BlockSpec((rb, T), lambda i: (i, 0))],
            out_specs=pl.BlockSpec((rb, T), lambda i: (i, 0)),
            compiler_params=pltpu.CompilerParams(
                dimension_semantics=("parallel",),
                vmem_limit_bytes=vmem_bytes,
            ),
            cost_estimate=cost,
        )(data)

    # ------------------------------------------------------------------ #
    # Two-pass, T-tiled path: long time series (or forced via t_block).
    # ------------------------------------------------------------------ #
    # Time tile: multiple of 128, or the full T.
    tb = 16384 if t_block is None else int(t_block)
    if tb >= T:
        tb = T
    elif tb % 128 != 0:
        tb = min(_round_up(tb, 128), _round_up(T, 128))
        if tb >= T:
            tb = T

    if row_block is not None:
        rb = _fix_rb(row_block, n_ts, sub)
    else:
        max_rows = max((block_budget // (tb * per_elem)) // sub * sub, sub)
        if n_ts <= sub:
            rb = n_ts
        else:
            half = -(-n_ts // 2)
            rb = _fix_rb(min(max_rows, _round_up(half, sub)), n_ts, sub)

    n_rb = pl.cdiv(n_ts, rb)
    n_tb = pl.cdiv(T, tb)

    # ---- pass 1: per-row mean and 1/std -------------------------------- #
    stats_vmem = rb * tb * (2 * in_size + 2 * 4) + 4 * rb * 4 + (2 << 20)
    stats_cost = pl.CostEstimate(
        flops=3 * n_ts * T,
        transcendentals=n_ts,
        bytes_accessed=n_ts * T * in_size + 2 * n_ts * 4,
    )
    mean, rstd = pl.pallas_call(
        functools.partial(_stats_kernel, total_t=T, t_block=tb),
        out_shape=(
            jax.ShapeDtypeStruct((n_ts, 1), jnp.float32),
            jax.ShapeDtypeStruct((n_ts, 1), jnp.float32),
        ),
        grid=(n_rb, n_tb),
        in_specs=[pl.BlockSpec((rb, tb), lambda i, t: (i, t))],
        out_specs=(
            pl.BlockSpec((rb, 1), lambda i, t: (i, 0)),
            pl.BlockSpec((rb, 1), lambda i, t: (i, 0)),
        ),
        compiler_params=pltpu.CompilerParams(
            dimension_semantics=("parallel", "arbitrary"),
            vmem_limit_bytes=int(min(max(stats_vmem, 8 << 20), vmem_limit)),
        ),
        cost_estimate=stats_cost,
    )(data)

    # ---- pass 2: normalize --------------------------------------------- #
    norm_vmem = rb * tb * per_elem + 4 * rb * 4 + (2 << 20)
    norm_cost = pl.CostEstimate(
        flops=2 * n_ts * T,
        transcendentals=0,
        bytes_accessed=n_ts * T * (in_size + out_size) + 2 * n_ts * 4,
    )
    return pl.pallas_call(
        _normalize_kernel,
        out_shape=jax.ShapeDtypeStruct((n_ts, T), data.dtype),
        grid=(n_rb, n_tb),
        in_specs=[
            pl.BlockSpec((rb, 1), lambda i, t: (i, 0)),
            pl.BlockSpec((rb, 1), lambda i, t: (i, 0)),
            pl.BlockSpec((rb, tb), lambda i, t: (i, t)),
        ],
        out_specs=pl.BlockSpec((rb, tb), lambda i, t: (i, t)),
        compiler_params=pltpu.CompilerParams(
            dimension_semantics=("parallel", "parallel"),
            vmem_limit_bytes=int(min(max(norm_vmem, 8 << 20), vmem_limit)),
        ),
        cost_estimate=norm_cost,
    )(mean, rstd, data)


# ---------------------------------------------------------------------------
# reference + tests
# ---------------------------------------------------------------------------

def _reference(data):
    """Pure-JAX reference mirroring the PyTorch forward."""
    data = data.astype(jnp.float32)
    mean = jnp.mean(data, axis=1, keepdims=True)
    std = jnp.std(data, axis=1, keepdims=True, ddof=1)  # unbiased, like torch
    return (data - mean) / std


if __name__ == "__main__":
    key = jax.random.PRNGKey(0)
    k1, k2, k3 = jax.random.split(key, 3)

    # Small EEG-like shape: (channels/time-series, time samples).
    # Single-pass path; auto row-block split into >= 2 blocks (v7x megacore).
    data = jax.random.normal(k1, (16, 256), dtype=jnp.float32) * 3.0 + 1.5
    out = jax.block_until_ready(mean_std_normalization(data))
    assert out.shape == data.shape and out.dtype == data.dtype
    assert jnp.allclose(out, _reference(data), atol=1e-5, rtol=1e-4)

    # Multi-row-block single-pass path with an explicit small row block.
    data2 = jax.random.normal(k2, (24, 512), dtype=jnp.float32) * 0.25 - 2.0
    out2 = jax.block_until_ready(mean_std_normalization(data2, row_block=8))
    assert jnp.allclose(out2, _reference(data2), atol=1e-5, rtol=1e-4)

    # T-tiled two-pass path (forced via t_block), with a ragged final time
    # block (640 = 2*256 + 128) to exercise the edge masking + accumulators.
    data3 = jax.random.normal(k3, (16, 640), dtype=jnp.float32) * 2.0 + 0.5
    out3 = jax.block_until_ready(mean_std_normalization(data3, t_block=256))
    assert out3.shape == data3.shape and out3.dtype == data3.dtype
    assert jnp.allclose(out3, _reference(data3), atol=1e-4, rtol=1e-4)

    print("KERNEL_OK")
</pallas_src>

<mosaic_0001>
module attributes {stable_mosaic.version = 11 : i64} {
  func.func @_meanstd_onepass_kernel(%arg0: i32, %arg1: memref<8x256xf32, #tpu.memory_space<vmem>>, %arg2: memref<8x256xf32, #tpu.memory_space<vmem>>) attributes {dimension_semantics = [#tpu.dimension_semantics<parallel>], iteration_bounds = array<i64: 2>, scalar_prefetch = 0 : i64, scratch_operands = 0 : i64, tpu.core_type = #tpu.core_type<tc>, window_params = [{transform_indices = @transform_0, window_bounds = array<i64: 8, 256>}, {transform_indices = @transform_1, window_bounds = array<i64: 8, 256>}]} {
    %c0 = arith.constant 0 : index
    %c0_0 = arith.constant 0 : index
    %0 = vector.load %arg1[%c0, %c0_0] : memref<8x256xf32, #tpu.memory_space<vmem>>, vector<8x256xf32>
    %cst = arith.constant dense<0.000000e+00> : vector<8xf32>
    %1 = vector.multi_reduction <add>, %0, %cst [1] : vector<8x256xf32> to vector<8xf32>
    %2 = vector.shape_cast %1 : vector<8xf32> to vector<8x1xf32>
    %cst_1 = arith.constant 2.560000e+02 : f32
    %3 = vector.broadcast %cst_1 : f32 to vector<8x1xf32>
    %4 = arith.divf %2, %3 : vector<8x1xf32>
    %5 = vector.broadcast %4 : vector<8x1xf32> to vector<8x256xf32>
    %6 = arith.subf %0, %5 : vector<8x256xf32>
    %7 = arith.mulf %6, %6 : vector<8x256xf32>
    %cst_2 = arith.constant dense<0.000000e+00> : vector<8xf32>
    %8 = vector.multi_reduction <add>, %7, %cst_2 [1] : vector<8x256xf32> to vector<8xf32>
    %9 = vector.shape_cast %8 : vector<8xf32> to vector<8x1xf32>
    %cst_3 = arith.constant 2.550000e+02 : f32
    %10 = vector.broadcast %cst_3 : f32 to vector<8x1xf32>
    %11 = arith.divf %9, %10 : vector<8x1xf32>
    %12 = math.rsqrt %11 : vector<8x1xf32>
    %13 = vector.broadcast %12 : vector<8x1xf32> to vector<8x256xf32>
    %14 = arith.mulf %6, %13 : vector<8x256xf32>
    %c0_4 = arith.constant 0 : index
    %c0_5 = arith.constant 0 : index
    %15 = vector.load %arg2[%c0_4, %c0_5] : memref<8x256xf32, #tpu.memory_space<vmem>>, vector<8x256xf32>
    tpu.vector_store %arg2[%c0_4, %c0_5], %14 {strides = array<i32>} : memref<8x256xf32, #tpu.memory_space<vmem>>, vector<8x256xf32>,
    return
  }
  func.func @transform_0(%arg0: i32) -> (i32, i32) {
    %c0_i32 = arith.constant 0 : i32
    %c0_i32_0 = arith.constant 0 : i32
    return %arg0, %c0_i32 : i32, i32
  }
  func.func @transform_1(%arg0: i32) -> (i32, i32) {
    %c0_i32 = arith.constant 0 : i32
    %c0_i32_0 = arith.constant 0 : i32
    return %arg0, %c0_i32 : i32, i32
  }
}

</mosaic_0001>

<bundles_post_ra>
// kernel: tpu_custom_call.1
= control target key start
LH: loop header
LB: loop body
LE: loop exit
PB: predicated region body
PF: predicated region fallthrough
CT: control target
= control target key end

     0   :  { %6 = vsyncpa [#allocation3], 0  ;;  %s574_s0 = inlined_call_operand.hbm [shape: f32[16,256], index: 0, kind: input, shape index: {}]   ;;  %s575_s1 = inlined_call_operand.hbm [shape: f32[16,256], index: 1, kind: output, shape index: {}]  }
   0x1   :  { %8 = vsyncpa [#allocation3 + $0x1], 0 }
   0x2   :  { %9 = vsyncpa [#allocation4], 0 }
   0x3   :  { %11 = vsyncpa [#allocation4 + $0x1], 0  ;;  %s413_s6 = smov 0   ;;  %s415_s7 = smov 0  }
   0x4   :  { %s417_s8 = smov 0   ;;  %s419_s9 = smov 0  }
   0x5 LB: > { %s434_s10 = sadd.s32 4294967295, %s399_s9   ;;  %s239_s11 = sadd.s32 4294967294, %s399_s9   ;;  %s399_s9 = sphi %s419_s9, %s590_s9   ;;  %s395_s8 = sphi %s417_s8, %s589_s8   ;;  %s391_s7 = sphi %s415_s7, %s588_s7   ;;  %s387_s6 = sphi %s413_s6, %s587_s6  }
   0x6   : > { %s438_s12 = sadd.s32 1, %s399_s9   ;;  %s24_s13 = sadd.s32 1, %s395_s8 }
   0x7   : > { %s21_s14 = ssub.s32 %s399_s9, %s438_s12  ;;  %p31_p0 = scmp.ne.s32.totalorder %s395_s8, %s391_s7 }
   0x8   : > { %p22_p1 = scmp.eq.s32.totalorder %s21_s14, 0  ;;  %p32_p2 = scmp.eq.s32.totalorder %s399_s9, 0 }
   0x9   : > { %p37_p3 = scmp.ne.s32.totalorder %s391_s7, %s387_s6  ;;  %p38_p4 = scmp.eq.s32.totalorder %s434_s10, 0 }
   0xa   : > { %s450_s15 = scalar_select %p22_p1, %s395_s8, %s24_s13  }
   0xb   : > { %p452_p5 = por %p32_p2, %p31_p0  ;;  %p456_p6 = por %p38_p4, %p37_p3 }
   0xc   : > { %p61_p7 = scmp.eq.s32.totalorder %s434_s10, 1  ;;  %p67_p8 = scmp.eq.s32.totalorder %s239_s11, 1 }
   0xd   : > { %p267_p10 = scmp.lt.s32.totalorder %s399_s9, 2  ;;  %s87_s20 = sand.u32 1, %s395_s8  }
   0xe   : > { %p463_p11 = por %p61_p7, %p31_p0  ;;  %p467_p12 = por %p67_p8, %p37_p3 }
   0xf   : > { %s253_s21 = sshll.u32 %s399_s9, 8  ;;  %s242_s22 = sshll.u32 %s87_s20, 4 }
  0x10   : > { %s579_s18 = scalar_select %p463_p11, 1, 0 }
  0x11   : > { %s580_s19 = scalar_select %p467_p12, 1, 0 }
  0x12   : > { %s476_s25 = scalar_lea.hbm %s574_s0, %s253_s21  ;;  %s91_s26 = scalar_lea.vmem [#allocation2], %s242_s22 }
  0x13   : > { %s99_s27 = sshll.u32 %s91_s26, 4  ;;  %p480_p13 = pnand %p267_p10, %p452_p5  ;;  %s484_s27 = int_to_ptr.vmem [resolvable:$true] %s99_s27 }
  0x14   : > { %s88_s29 = scalar_lea.sflag [#allocation3], %s87_s20  ;;  %s303_s30 = scalar_lea.hbm %s476_s25, 256 }
  0x15   : > { %p304_p2 = scmp.ne.s32.totalorder %s476_s25, %s303_s30  ;;  %p305_p3 = pneg %p480_p13 }
  0x16   : > { %s308_s4 = scalar_lea.hbm %s574_s0, 512  ;;  %p309_p5 = scmp.lt.u32.totalorder %s476_s25, %s574_s0 }
  0x17   : > { %p306_p4 = pnand %p305_p3, %p304_p2  ;;  %p310_p8 = scmp.lt.u32.totalorder %s308_s4, %s303_s30 }
  0x18   : > { %p312_p9 = scmp.lt.u32.totalorder %s303_s30, %s476_s25 }
  0x19   : > { %p307_p7 = pneg %p306_p4  ;;  %p311_p10 = por %p310_p8, %p309_p5 }
  0x1b   : > { %p313_p0 = por %p312_p9, %p311_p10 }
  0x1d   : > { %p314_p1 = pnand %p313_p0, %p307_p7 }
  0x1f   : > { %317 = shalt.err (!%p314_p1)
}
  0x20   : > { %s318_s13 = scalar_lea.vmem %s484_s27, 256  ;;  %s401_s14 = smov [#allocation2]  }
  0x21   : > { %p319_p2 = scmp.ne.s32.totalorder %s484_s27, %s318_s13  ;;  %s323_s16 = sshll.u32 %s401_s14, 4  ;;  %s324_s16 = int_to_ptr.vmem [resolvable:$false] %s323_s16 }
  0x22   : > { %s325_s20 = scalar_lea.vmem %s324_s16, 512  ;;  %p326_p11 = scmp.lt.s32.totalorder %s484_s27, %s324_s16 }
  0x23   : > { %p321_p4 = pnand %p319_p2, %p305_p3  ;;  %p327_p5 = scmp.lt.s32.totalorder %s325_s20, %s318_s13 }
  0x25   : > { %p322_p12 = pneg %p321_p4  ;;  %p328_p8 = por %p327_p5, %p326_p11 }
  0x27   : > { %p329_p9 = pnand %p328_p8, %p322_p12 }
  0x29   : > { %332 = shalt.err (!%p329_p9)
}
  0x2a   : > { %262 = dma.hbm_to_vmem [thread:$0]  (!%p480_p13), %s476_s25, 256, %s484_s27, %s88_s29  }
  0x2b   : > { %p582_p0 = scmp.lt.s32.totalorder %s399_s9, 3  ;;  %p583_p1 = scmp.ge.s32.totalorder %s399_s9, 1 }
  0x2d   : > { %p105_p3 = pnand %p583_p1, %p582_p0 }
  0x2e   : > { %s518_s21 = sand.u32 (!%p105_p3), 1, %s391_s7  }
  0x2f   : > { %108 = sbr.rel (%p105_p3) target bundleno = 379 (0x17b), region = 24  ;;  %s246_s22 = sshll.u32 (!%p105_p3), %s518_s21, 4 }
  0x30   : > { %s111_s23 = scalar_lea.sflag (!%p105_p3), [#allocation3], %s518_s21  ;;  %s114_s24 = scalar_lea.vmem (!%p105_p3), [#allocation2], %s246_s22 }
  0x36   : > { %378 = dma.done.wait (%p456_p6), %s111_s23, 256  }
  0x37   : > { %380 = vsyncadd (%p456_p6), %s111_s23, 4294967040  ;;  %v133_v0 = vld [vmem:[%s114_s24] sm:$0xff]  ;;  %v134_v1 = vld [vmem:[%s114_s24 + $0x8] sm:$0xff]  ;;  %s254_s17 = sshll.u32 %s434_s10, 8  ;;  %s132_s25 = scalar_lea.vmem [#allocation5], %s246_s22 }
  0x38   : > { %v135_v2 = vadd.f32 %v134_v1, %v133_v0  ;;  %s169_s26 = sshll.u32 %s132_s25, 4  ;;  %s530_s29 = scalar_lea.hbm %s575_s1, %s254_s17  ;;  %s532_s26 = int_to_ptr.vmem [resolvable:$true] %s169_s26 }
  0x39   : > { %s155_s30 = scalar_lea.sflag [#allocation4], %s518_s21  ;;  %s333_s2 = scalar_lea.vmem %s532_s26, 256 }
  0x3a   : > { %136 = vadd.xlane.f32.xlu0 %v135_v2  ;;  %p334_p6 = scmp.ne.s32.totalorder %s532_s26, %s333_s2  ;;  %p584_p11 = scmp.ne.s32.totalorder %s579_s18, 0 }
  0x3b   : > { %s402_s10 = smov [#allocation5]  }
  0x3c   : > { %p335_p12 = pnand %p334_p6, %p584_p11  ;;  %s337_s3 = sshll.u32 %s402_s10, 4  ;;  %s338_s3 = int_to_ptr.vmem [resolvable:$false] %s337_s3 }
  0x3d   : > { %s339_s4 = scalar_lea.vmem %s338_s3, 512  ;;  %p340_p7 = scmp.lt.s32.totalorder %s532_s26, %s338_s3 }
  0x3e   : > { %p336_p13 = pneg %p335_p12  ;;  %p341_p10 = scmp.lt.s32.totalorder %s339_s4, %s333_s2 }
  0x40   : > { %p342_p2 = por %p341_p10, %p340_p7 }
  0x42   : > { %p343_p4 = pnand %p342_p2, %p336_p13 }
  0xc7   : > { %v137_v3 = vpop.xlane.xlu0 %136 }
  0xc8   : > { %v139_v4 = vmul.f32 0.00390625, %v137_v3 }
  0xca   : > { %v140_v5 = vsub.f32 %v133_v0, %v139_v4  ;;  %v141_v6 = vsub.f32 %v134_v1, %v139_v4 }
  0xcc   : > { %v142_v7 = vmul.f32 %v140_v5, %v140_v5  ;;  %v143_v8 = vmul.f32 %v141_v6, %v141_v6 }
  0xce   : > { %v144_v9 = vadd.f32 %v143_v8, %v142_v7 }
  0xd0   : > { %145 = vadd.xlane.f32.xlu0 %v144_v9 }
 0x15d   : > { %v146_v10 = vpop.xlane.xlu0 %145 }
 0x15e   : > { %v148_v11 = vmul.f32 0.003921569, %v146_v10 }
 0x160   : > { %301 = vrsqrt.f32 %v148_v11 }
 0x16a   : > { %v302_v12 = vpop.eup %301 }
 0x16b   : > { %v150_v13 = vmul.f32 %v302_v12, %v140_v5  ;;  %v151_v14 = vmul.f32 %v302_v12, %v141_v6 }
 0x16d   : > { %152 = vst [vmem:[%s132_s25] sm:$0xff] %v150_v13  ;;  %153 = vst [vmem:[%s132_s25 + $0x8] sm:$0xff] %v151_v14 }
 0x16e   : > { %346 = shalt.err (!%p343_p4)
}
 0x16f   : > { %s347_s5 = scalar_lea.hbm %s530_s29, 256  ;;  %s351_s14 = scalar_lea.hbm %s575_s1, 512 }
 0x170   : > { %p348_p5 = scmp.ne.s32.totalorder %s530_s29, %s347_s5  ;;  %p352_p0 = scmp.lt.u32.totalorder %s530_s29, %s575_s1 }
 0x171   : > { %p353_p1 = scmp.lt.u32.totalorder %s351_s14, %s347_s5  ;;  %p355_p6 = scmp.lt.u32.totalorder %s347_s5, %s530_s29 }
 0x172   : > { %p349_p8 = pnand %p348_p5, %p584_p11 }
 0x173   : > { %p354_p3 = por %p353_p1, %p352_p0 }
 0x174   : > { %p350_p9 = pneg %p349_p8 }
 0x175   : > { %p356_p12 = por %p355_p6, %p354_p3 }
 0x177   : > { %p357_p13 = pnand %p356_p12, %p350_p9 }
 0x179   : > { %360 = shalt.err (!%p357_p13)
}
 0x17a   : > { %257 = dma.vmem_to_hbm [thread:$0]  (%p584_p11), %s532_s26, 256, %s530_s29, %s155_s30  }
 0x17b PF: > { %s181_s21 = sand.u32 1, %s387_s6   ;;  %p585_p7 = scmp.ne.s32.totalorder %s580_s19, 0 }
 0x17c   : > { %p586_p10 = scmp.ge.s32.totalorder %s399_s9, 2  ;;  %s182_s22 = scalar_lea.sflag [#allocation4], %s181_s21 }
 0x17e   : > { %p264_p2 = pnand %p586_p10, %p585_p7 }
 0x180   : > { %382 = dma.done.wait (!%p264_p2), %s182_s22, 256  }
 0x181   : > { %384 = vsyncadd (!%p264_p2), %s182_s22, 4294967040  ;;  %p14_p4 = scmp.ge.s32.totalorder %s438_s12, 4   ;;  %s587_s6 = smov %s391_s7 }
 0x182   : > { %s588_s7 = smov %s395_s8  ;;  %s589_s8 = smov %s450_s15 }
 0x183   : > { %s590_s9 = smov %s438_s12  ;;  %16 = sbr.rel (!%p14_p4) target bundleno = 5 (0x5), region = 69 }
 0x18a   :  { %187 = vsyncpa [#allocation3], 1 }
 0x18b   :  { %189 = vsyncpa [#allocation3 + $0x1], 1 }
 0x18c   :  { %190 = vsyncpa [#allocation4], 1 }
 0x18d   :  { %192 = vsyncpa [#allocation4 + $0x1], 1 }

</bundles_post_ra>
